<compile_context>
chip_gen: v7x
topology: tpu7x:2x2x1
jax: 0.10.0
libtpu: 0.0.40
codegen_flags: <defaults>
</compile_context>

<pallas_src>
import functools

import jax
import jax.numpy as jnp
from jax.experimental import pallas as pl
from jax.experimental.pallas import tpu as pltpu

_MIB = 1024 * 1024


def _round_up(x: int, m: int) -> int:
    return ((x + m - 1) // m) * m


def mlp_kernel(x_ref, gamma_ref, beta_ref, w_ref, b_ref, o_ref, xln_ref,
               *, d_in: int, eps: float):
    """One (batch_tile, d_out_tile) step of fused LayerNorm + Linear.

    x_ref:      (block_b, d_in_pad)   bf16 (zero-padded past d_in)
    gamma/beta: (1, d_in_pad)         f32, zero-padded past d_in
    w_ref:      (d_in_pad, block_n)   bf16, zero-padded
    b_ref:      (1, block_n)          f32, zero-padded
    o_ref:      (block_b, block_n)
    xln_ref:    VMEM scratch (block_b, d_in_pad) bf16 — LN output, computed
                once per batch tile (j == 0) and reused for every d_out tile.
    """
    j = pl.program_id(1)

    @pl.when(j == 0)
    def _():
        # TODO(synk): for tiny-D_out shapes (1-2 j tiles) this LN prologue is
        # not amortized; a chunked LN or a separate LN pallas_call would let
        # both matmul grid axes be parallel.
        x = x_ref[...].astype(jnp.float32)
        # Padded columns are zero, so the unmasked mean over 1/d_in is exact;
        # the variance term is explicitly masked to the real d_in.
        col = jax.lax.broadcasted_iota(jnp.int32, x.shape, 1)
        valid = col < d_in
        inv_n = jnp.float32(1.0 / d_in)
        mean = jnp.sum(x, axis=-1, keepdims=True) * inv_n
        centered = jnp.where(valid, x - mean, 0.0)
        var = jnp.sum(centered * centered, axis=-1, keepdims=True) * inv_n
        inv_std = jax.lax.rsqrt(var + eps)
        xln = centered * inv_std * gamma_ref[...] + beta_ref[...]
        # bf16 scratch: MXU-native operand dtype, half the footprint.
        xln_ref[...] = xln.astype(jnp.bfloat16)

    # bf16 x bf16 -> f32 accumulation on the MXU.
    acc = jnp.dot(xln_ref[...], w_ref[...], preferred_element_type=jnp.float32)
    o_ref[...] = (acc + b_ref[...]).astype(o_ref.dtype)


def prepare_mlp_params(ln_weight, ln_bias, fc_weight, fc_bias):
    """One-time parameter prep (hoisted out of the hot path).

    Stores the Linear weight pre-transposed as bf16 (D_in_pad, D_out_pad) and
    pads gamma/beta/bias to lane-aligned widths so no per-call HBM
    transpose/cast/pad is emitted.
    """
    D_out, D_in = fc_weight.shape
    d_in_pad = _round_up(D_in, 128)
    d_out_pad = _round_up(D_out, 256)   # 256-aligned for the 256-wide MXU
    gamma = jnp.pad(ln_weight.astype(jnp.float32),
                    (0, d_in_pad - D_in)).reshape(1, d_in_pad)
    beta = jnp.pad(ln_bias.astype(jnp.float32),
                   (0, d_in_pad - D_in)).reshape(1, d_in_pad)
    w_t = jnp.pad(fc_weight.T.astype(jnp.bfloat16),
                  ((0, d_in_pad - D_in), (0, d_out_pad - D_out)))
    bias = jnp.pad(fc_bias.astype(jnp.float32),
                   (0, d_out_pad - D_out)).reshape(1, d_out_pad)
    return {
        "gamma": gamma, "beta": beta, "w_t": w_t, "bias": bias,
        "d_in": D_in, "d_out": D_out,
        "d_in_pad": d_in_pad, "d_out_pad": d_out_pad,
    }


def _tpu_tiling_defaults():
    """Generation-aware (max batch tile, scoped-VMEM cap in bytes)."""
    kind = ""
    try:
        kind = jax.devices()[0].device_kind.lower()
    except Exception:
        pass
    vmem_phys = None
    try:
        vmem_phys = int(pltpu.get_tpu_info().vmem_capacity_bytes)
    except Exception:
        pass
    is_v7 = ("v7" in kind) or (vmem_phys is not None and vmem_phys <= 64 * _MIB)
    is_v5e = ("v5 lite" in kind) or ("v5e" in kind) or ("v5lite" in kind)
    if is_v7:
        # 64 MiB physical VMEM; ~3.2 TB/s HBM -> ~310 FLOP/weight-byte suffices.
        return 256, 38 * _MIB
    if is_v5e:
        # ~240 FLOP/byte compute:HBM ratio already matched at block_b=256.
        return 256, 100 * _MIB
    # v6e (and default): ~640 FLOP/weight-byte needed -> big batch tiles.
    return 1024, 100 * _MIB


def _step_vmem_bytes(block_b, block_n, d_in_pad, out_itemsize):
    """Per-step VMEM footprint: double-buffered tiles + bf16 LN scratch."""
    return (2 * block_b * d_in_pad * 2              # bf16 x tiles
            + 2 * d_in_pad * block_n * 2            # bf16 weight tiles
            + 2 * block_b * block_n * out_itemsize  # output tiles
            + 2 * (2 * d_in_pad + block_n) * 4      # gamma/beta/bias
            + block_b * d_in_pad * 2)               # bf16 xln scratch (single)


def mlp_forward(x, params, *, block_b=None, block_n=None,
                out_dtype=jnp.float32, eps=1e-5):
    """Equivalent of Mlp.forward(x) logits path: fc(ln(x)).

    x:      (B, D_in)
    params: output of prepare_mlp_params() (weight prep done once, not here)
    returns (B, D_out) in out_dtype.
    """
    B, D_in = x.shape
    assert D_in == params["d_in"]
    D_out = params["d_out"]
    d_in_pad = params["d_in_pad"]
    d_out_pad = params["d_out_pad"]

    block_b_max, vmem_cap = _tpu_tiling_defaults()

    # D_out tile: 512 where it divides, else 256 (never 128: 256-wide MXU).
    if block_n is None:
        block_n = 512 if d_out_pad % 512 == 0 else 256
    assert block_n % 128 == 0 and d_out_pad % block_n == 0

    # Batch tile: generation-aware max, 16-aligned (bf16 scratch sublanes),
    # split so the "parallel" axis has >=2 steps whenever the batch allows
    # (both v7x TensorCores / megacore halves get a tile).
    if block_b is None:
        block_b = min(block_b_max, _round_up(B, 16))
        if B >= 256 and _round_up(B, block_b) // block_b < 2:
            block_b = _round_up(-(-B // 2), 16)
    block_b = _round_up(block_b, 16)

    out_item = jnp.dtype(out_dtype).itemsize
    # Shrink tiles if the per-step footprint would overflow the VMEM budget
    # (matters on v7x with large D_in).
    while (_step_vmem_bytes(block_b, block_n, d_in_pad, out_item) + 4 * _MIB
           > vmem_cap) and block_b > 128:
        block_b //= 2
    while (_step_vmem_bytes(block_b, block_n, d_in_pad, out_item) + 4 * _MIB
           > vmem_cap) and block_n > 256:
        block_n //= 2

    b_pad = _round_up(B, block_b)

    # bf16 at the x memory edge: halves x DMA and its VMEM double-buffer.
    x_p = jnp.pad(x.astype(jnp.bfloat16),
                  ((0, b_pad - B), (0, d_in_pad - D_in)))

    grid = (b_pad // block_b, d_out_pad // block_n)

    est = _step_vmem_bytes(block_b, block_n, d_in_pad, out_item)
    vmem_limit = int(min(max(est + 4 * _MIB, 16 * _MIB), vmem_cap))

    kernel = functools.partial(mlp_kernel, d_in=D_in, eps=eps)

    out = pl.pallas_call(
        kernel,
        out_shape=jax.ShapeDtypeStruct((b_pad, d_out_pad), out_dtype),
        grid_spec=pltpu.PrefetchScalarGridSpec(
            num_scalar_prefetch=0,
            grid=grid,
            in_specs=[
                pl.BlockSpec((block_b, d_in_pad), lambda i, j: (i, 0)),
                pl.BlockSpec((1, d_in_pad), lambda i, j: (0, 0)),
                pl.BlockSpec((1, d_in_pad), lambda i, j: (0, 0)),
                pl.BlockSpec((d_in_pad, block_n), lambda i, j: (0, j)),
                pl.BlockSpec((1, block_n), lambda i, j: (0, j)),
            ],
            out_specs=pl.BlockSpec((block_b, block_n), lambda i, j: (i, j)),
            scratch_shapes=[pltpu.VMEM((block_b, d_in_pad), jnp.bfloat16)],
        ),
        compiler_params=pltpu.CompilerParams(
            # NOTE: the xln-scratch reuse requires the j axis to stay
            # sequential ("arbitrary"); do not mark it parallel.
            dimension_semantics=("parallel", "arbitrary"),
            vmem_limit_bytes=vmem_limit,
        ),
    )(x_p, params["gamma"], params["beta"], params["w_t"], params["bias"])

    return out[:B, :D_out]


def mlp_reference(x, ln_weight, ln_bias, fc_weight, fc_bias,
                  *, match_bf16=True, eps=1e-5):
    xf = x.astype(jnp.float32)
    if match_bf16:
        xf = xf.astype(jnp.bfloat16).astype(jnp.float32)   # kernel sees bf16 x
    mean = xf.mean(-1, keepdims=True)
    var = ((xf - mean) ** 2).mean(-1, keepdims=True)
    xln = (xf - mean) * jax.lax.rsqrt(var + eps) * ln_weight + ln_bias
    w_t = fc_weight.T.astype(jnp.float32)
    if match_bf16:
        xln = xln.astype(jnp.bfloat16).astype(jnp.float32)
        w_t = w_t.astype(jnp.bfloat16).astype(jnp.float32)
    return xln @ w_t + fc_bias


if __name__ == "__main__":
    key = jax.random.PRNGKey(0)
    B, D_in, D_out = 16, 72, 200   # non-128-multiples: exercises padding/masking

    k_x, k_lw, k_lb, k_fw, k_fb = jax.random.split(key, 5)
    x = jax.random.normal(k_x, (B, D_in), dtype=jnp.float32)

    # Deterministic synthetic parameters (shapes match nn.LayerNorm / nn.Linear).
    ln_weight = jnp.ones((D_in,), jnp.float32) + 0.01 * jax.random.normal(k_lw, (D_in,))
    ln_bias = 0.01 * jax.random.normal(k_lb, (D_in,))
    fc_weight = jax.random.normal(k_fw, (D_out, D_in), jnp.float32) / jnp.sqrt(D_in)
    fc_bias = 0.01 * jax.random.normal(k_fb, (D_out,))

    # Weight prep is paid once here (hoisted out of the hot path).
    params = prepare_mlp_params(ln_weight, ln_bias, fc_weight, fc_bias)

    logits = mlp_forward(x, params)
    jax.block_until_ready(logits)
    assert logits.shape == (B, D_out)

    # Tight check against a reference that mirrors the bf16 x / bf16 matmul inputs.
    ref_bf16 = mlp_reference(x, ln_weight, ln_bias, fc_weight, fc_bias, match_bf16=True)
    assert jnp.allclose(logits, ref_bf16, atol=2e-3, rtol=2e-3), \
        "mismatch vs bf16-matched reference"

    # Loose sanity check against the full-f32 reference (bf16 edge tolerance).
    ref_f32 = mlp_reference(x, ln_weight, ln_bias, fc_weight, fc_bias, match_bf16=False)
    assert jnp.allclose(logits, ref_f32, atol=5e-2, rtol=5e-2), \
        "mismatch vs f32 reference"

    # TODO(synk): CrossEntropyLoss branch (y is not None and return_loss) stays
    # in plain JAX outside the kernel; forward() default path returns (logits, y).
    y = None
    out = (logits, y)

    print("KERNEL_OK")
</pallas_src>

<mosaic_0001>
module attributes {stable_mosaic.version = 11 : i64} {
  func.func @mlp_kernel(%arg0: i32, %arg1: i32, %arg2: memref<16x128xbf16, #tpu.memory_space<vmem>>, %arg3: memref<1x128xf32, #tpu.memory_space<vmem>>, %arg4: memref<1x128xf32, #tpu.memory_space<vmem>>, %arg5: memref<128x256xbf16, #tpu.memory_space<vmem>>, %arg6: memref<1x256xf32, #tpu.memory_space<vmem>>, %arg7: memref<16x256xf32, #tpu.memory_space<vmem>>, %arg8: memref<16x128xbf16, #tpu.memory_space<vmem>>) attributes {dimension_semantics = [#tpu.dimension_semantics<parallel>, #tpu.dimension_semantics<arbitrary>], iteration_bounds = array<i64: 1, 1>, scalar_prefetch = 0 : i64, scratch_operands = 1 : i64, tpu.core_type = #tpu.core_type<tc>, window_params = [{transform_indices = @transform_0, window_bounds = array<i64: 16, 128>}, {pipeline_mode = #tpu.pipeline_mode<synchronous>, transform_indices = @transform_1, window_bounds = array<i64: 1, 128>}, {pipeline_mode = #tpu.pipeline_mode<synchronous>, transform_indices = @transform_2, window_bounds = array<i64: 1, 128>}, {transform_indices = @transform_3, window_bounds = array<i64: 128, 256>}, {transform_indices = @transform_4, window_bounds = array<i64: 1, 256>}, {transform_indices = @transform_5, window_bounds = array<i64: 16, 256>}]} {
    %c0_i32 = arith.constant 0 : i32
    %0 = arith.cmpi eq, %arg1, %c0_i32 : i32
    %1 = arith.extui %0 : i1 to i32
    %c0_i32_0 = arith.constant 0 : i32
    %2 = arith.cmpi ne, %1, %c0_i32_0 : i32
    scf.if %2 {
      %c0_8 = arith.constant 0 : index
      %c0_9 = arith.constant 0 : index
      %10 = vector.load %arg2[%c0_8, %c0_9] : memref<16x128xbf16, #tpu.memory_space<vmem>>, vector<16x128xbf16>
      %11 = arith.extf %10 : vector<16x128xbf16> to vector<16x128xf32>
      %12 = tpu.iota {dimensions = array<i32: 1>} : vector<16x128xi32>
      %c72_i32 = arith.constant 72 : i32
      %13 = vector.broadcast %c72_i32 : i32 to vector<16x128xi32>
      %14 = arith.cmpi slt, %12, %13 : vector<16x128xi32>
      %cst_10 = arith.constant dense<0.000000e+00> : vector<16xf32>
      %15 = vector.multi_reduction <add>, %11, %cst_10 [1] : vector<16x128xf32> to vector<16xf32>
      %16 = vector.shape_cast %15 : vector<16xf32> to vector<16x1xf32>
      %cst_11 = arith.constant 0.013888889 : f32
      %17 = vector.broadcast %cst_11 : f32 to vector<16x1xf32>
      %18 = arith.mulf %16, %17 : vector<16x1xf32>
      %19 = vector.broadcast %18 : vector<16x1xf32> to vector<16x128xf32>
      %20 = arith.subf %11, %19 : vector<16x128xf32>
      %cst_12 = arith.constant 0.000000e+00 : f32
      %21 = vector.broadcast %cst_12 : f32 to vector<16x128xf32>
      %22 = arith.select %14, %20, %21 : vector<16x128xi1>, vector<16x128xf32>
      %23 = arith.mulf %22, %22 : vector<16x128xf32>
      %cst_13 = arith.constant dense<0.000000e+00> : vector<16xf32>
      %24 = vector.multi_reduction <add>, %23, %cst_13 [1] : vector<16x128xf32> to vector<16xf32>
      %25 = vector.shape_cast %24 : vector<16xf32> to vector<16x1xf32>
      %cst_14 = arith.constant 0.013888889 : f32
      %26 = vector.broadcast %cst_14 : f32 to vector<16x1xf32>
      %27 = arith.mulf %25, %26 : vector<16x1xf32>
      %cst_15 = arith.constant 9.99999974E-6 : f32
      %28 = vector.broadcast %cst_15 : f32 to vector<16x1xf32>
      %29 = arith.addf %27, %28 : vector<16x1xf32>
      %30 = math.rsqrt %29 : vector<16x1xf32>
      %31 = vector.broadcast %30 : vector<16x1xf32> to vector<16x128xf32>
      %32 = arith.mulf %22, %31 : vector<16x128xf32>
      %c0_16 = arith.constant 0 : index
      %c0_17 = arith.constant 0 : index
      %33 = vector.load %arg3[%c0_16, %c0_17] : memref<1x128xf32, #tpu.memory_space<vmem>>, vector<1x128xf32>
      %34 = vector.broadcast %33 : vector<1x128xf32> to vector<16x128xf32>
      %35 = arith.mulf %32, %34 : vector<16x128xf32>
      %c0_18 = arith.constant 0 : index
      %c0_19 = arith.constant 0 : index
      %36 = vector.load %arg4[%c0_18, %c0_19] : memref<1x128xf32, #tpu.memory_space<vmem>>, vector<1x128xf32>
      %37 = vector.broadcast %36 : vector<1x128xf32> to vector<16x128xf32>
      %38 = arith.addf %35, %37 : vector<16x128xf32>
      %39 = arith.truncf %38 : vector<16x128xf32> to vector<16x128xbf16>
      %c0_20 = arith.constant 0 : index
      %c0_21 = arith.constant 0 : index
      %40 = vector.load %arg8[%c0_20, %c0_21] : memref<16x128xbf16, #tpu.memory_space<vmem>>, vector<16x128xbf16>
      tpu.vector_store %arg8[%c0_20, %c0_21], %39 {strides = array<i32>} : memref<16x128xbf16, #tpu.memory_space<vmem>>, vector<16x128xbf16>,
    } else {
    }
    %c0 = arith.constant 0 : index
    %c0_1 = arith.constant 0 : index
    %3 = vector.load %arg8[%c0, %c0_1] : memref<16x128xbf16, #tpu.memory_space<vmem>>, vector<16x128xbf16>
    %c0_2 = arith.constant 0 : index
    %c0_3 = arith.constant 0 : index
    %4 = vector.load %arg5[%c0_2, %c0_3] : memref<128x256xbf16, #tpu.memory_space<vmem>>, vector<128x256xbf16>
    %cst = arith.constant dense<0.000000e+00> : vector<16x256xf32>
    %5 = tpu.matmul %3, %4, %cst {dimension_numbers = #tpu.dot_dimension_numbers<[1], [0], [0], [1], [0, 0, 1, 1], [], []>} : vector<16x128xbf16>, vector<128x256xbf16>, vector<16x256xf32> -> vector<16x256xf32>
    %c0_4 = arith.constant 0 : index
    %c0_5 = arith.constant 0 : index
    %6 = vector.load %arg6[%c0_4, %c0_5] : memref<1x256xf32, #tpu.memory_space<vmem>>, vector<1x256xf32>
    %7 = vector.broadcast %6 : vector<1x256xf32> to vector<16x256xf32>
    %8 = arith.addf %5, %7 : vector<16x256xf32>
    %c0_6 = arith.constant 0 : index
    %c0_7 = arith.constant 0 : index
    %9 = vector.load %arg7[%c0_6, %c0_7] : memref<16x256xf32, #tpu.memory_space<vmem>>, vector<16x256xf32>
    tpu.vector_store %arg7[%c0_6, %c0_7], %8 {strides = array<i32>} : memref<16x256xf32, #tpu.memory_space<vmem>>, vector<16x256xf32>,
    return
  }
  func.func @transform_0(%arg0: i32, %arg1: i32) -> (i32, i32) {
    %c0_i32 = arith.constant 0 : i32
    %c0_i32_0 = arith.constant 0 : i32
    return %arg0, %c0_i32 : i32, i32
  }
  func.func @transform_1(%arg0: i32, %arg1: i32) -> (i32, i32) {
    %c0_i32 = arith.constant 0 : i32
    %c0_i32_0 = arith.constant 0 : i32
    %c0_i32_1 = arith.constant 0 : i32
    return %c0_i32, %c0_i32_0 : i32, i32
  }
  func.func @transform_2(%arg0: i32, %arg1: i32) -> (i32, i32) {
    %c0_i32 = arith.constant 0 : i32
    %c0_i32_0 = arith.constant 0 : i32
    %c0_i32_1 = arith.constant 0 : i32
    return %c0_i32, %c0_i32_0 : i32, i32
  }
  func.func @transform_3(%arg0: i32, %arg1: i32) -> (i32, i32) {
    %c0_i32 = arith.constant 0 : i32
    %c0_i32_0 = arith.constant 0 : i32
    return %c0_i32, %arg1 : i32, i32
  }
  func.func @transform_4(%arg0: i32, %arg1: i32) -> (i32, i32) {
    %c0_i32 = arith.constant 0 : i32
    %c0_i32_0 = arith.constant 0 : i32
    return %c0_i32, %arg1 : i32, i32
  }
  func.func @transform_5(%arg0: i32, %arg1: i32) -> (i32, i32) {
    %c0_i32 = arith.constant 0 : i32
    return %arg0, %arg1 : i32, i32
  }
}

</mosaic_0001>

<bundles_post_ra>
// kernel: tpu_custom_call.1
= control target key start
LH: loop header
LB: loop body
LE: loop exit
PB: predicated region body
PF: predicated region fallthrough
CT: control target
= control target key end

     0   :  { %10 = vsyncpa [#allocation4], 0  ;;  %s496_s0 = inlined_call_operand.hbm [shape: bf16[16,128], index: 0, kind: input, shape index: {}]   ;;  %s497_s1 = inlined_call_operand.vmem [shape: f32[1,128], index: 1, kind: input, shape index: {}]   ;;  %s498_s2 = inlined_call_operand.vmem [shape: f32[1,128], index: 2, kind: input, shape index: {}]   ;;  %s499_s3 = inlined_call_operand.hbm [shape: bf16[128,256], index: 3, kind: input, shape index: {}]   ;;  %s500_s4 = inlined_call_operand.vmem [shape: f32[1,256], index: 4, kind: input, shape index: {}]   ;;  %s501_s5 = inlined_call_operand.hbm [shape: f32[16,256], index: 5, kind: output, shape index: {}]  }
   0x1   :  { %11 = vsyncpa [#allocation7], 0 }
   0x2   :  { %12 = vsyncpa [#allocation5], 0  ;;  %s411_s18 = smov [#allocation3]   ;;  %s339_s22 = scalar_lea.hbm %s496_s0, 128 }
   0x3   :  { %s18_s19 = sshll.u32 %s411_s18, 4  ;;  %p340_p0 = scmp.ne.s32.totalorder %s496_s0, %s339_s22  ;;  %s19_s19 = int_to_ptr.vmem [resolvable:$true] %s18_s19 }
   0x4   :  { %p343_p1 = scmp.lt.u32.totalorder %s339_s22, %s496_s0 }
   0x6   :  { %p345_p2 = pnand %p343_p1, %p340_p0 }
   0x8   :  { %348 = shalt.err (!%p345_p2)
}
   0x9   :  { %s349_s27 = scalar_lea.vmem %s19_s19, 128  ;;  %p354_p4 = scmp.lt.s32.totalorder %s19_s19, %s19_s19 }
   0xa   :  { %p350_p3 = scmp.ne.s32.totalorder %s19_s19, %s349_s27  ;;  %p355_p5 = scmp.lt.s32.totalorder %s349_s27, %s349_s27 }
   0xc   :  { %p356_p6 = por %p355_p5, %p354_p4 }
   0xe   :  { %p357_p7 = pnand %p356_p6, %p350_p3 }
  0x10   :  { %360 = shalt.err (!%p357_p7)
}
  0x11   :  { %s412_s28 = smov 64   ;;  %s413_s29 = smov 4  }
  0x12   :  { %24 = dma.hbm_to_vmem [thread:$0]  %s496_s0, 128, %s19_s19, [#allocation4], %s412_s28, %s412_s28, %s413_s29  }
  0x13   :  { %s414_s7 = smov [#allocation6]   ;;  %s361_s11 = scalar_lea.hbm %s499_s3, 2048 }
  0x14   :  { %s34_s8 = sshll.u32 %s414_s7, 4  ;;  %p362_p8 = scmp.ne.s32.totalorder %s499_s3, %s361_s11  ;;  %s35_s8 = int_to_ptr.vmem [resolvable:$true] %s34_s8 }
  0x15   :  { %p365_p9 = scmp.lt.u32.totalorder %s361_s11, %s499_s3 }
  0x17   :  { %p367_p10 = pnand %p365_p9, %p362_p8 }
  0x19   :  { %370 = shalt.err (!%p367_p10)
}
  0x1a   :  { %s371_s16 = scalar_lea.vmem %s35_s8, 2048  ;;  %p376_p12 = scmp.lt.s32.totalorder %s35_s8, %s35_s8 }
  0x1b   :  { %p372_p11 = scmp.ne.s32.totalorder %s35_s8, %s371_s16  ;;  %p377_p13 = scmp.lt.s32.totalorder %s371_s16, %s371_s16 }
  0x1d   :  { %p378_p0 = por %p377_p13, %p376_p12 }
  0x1f   :  { %p379_p1 = pnand %p378_p0, %p372_p11 }
  0x21   :  { %382 = shalt.err (!%p379_p1)
}
  0x22   :  { %s415_s0 = smov 128   ;;  %s416_s17 = smov 8  }
  0x23   :  { %40 = dma.hbm_to_vmem [thread:$0]  %s499_s3, 2048, %s35_s8, [#allocation7], %s415_s0, %s415_s0, %s416_s17  }
  0x24   :  { %405 = dma.done.wait [#allocation4], 128  }
  0x25   :  { %406 = vsyncadd [#allocation4], 4294967168 }
  0x26   :  { %407 = dma.done.wait [#allocation7], 2048  }
  0x27   :  { %408 = vsyncadd [#allocation7], 4294965248  ;;  %v298_v0 = vld [vmem:[#allocation3] sm:$0xff]   ;;  %v311_v3 = vld [vmem:[#allocation6 + $0x4] ss:$8 sps:$4 sm:$0xff]   ;;  %v58_v6 = vlaneseq  ;;  %v417_v26 = vmov 0  }
  0x28   :  { %v299_v1 = vunpack.c.l.bf16 %v298_v0  ;;  %v300_v2 = vunpack.c.h.bf16 %v298_v0  ;;  %v313_v4 = vld [vmem:[#allocation6] ss:$8 sps:$4 sm:$0xff]   ;;  %v314_v5 = vld [vmem:[#allocation6 + $0x14] ss:$8 sps:$4 sm:$0xff]   ;;  %214 = vmatprep.subr.bf16.mxu0 %v311_v3  ;;  %v316_v18 = vld [vmem:[#allocation6 + $0x10] ss:$8 sps:$4 sm:$0xff]   ;;  %246 = vmatprep.mubr.bf16.mxu0 %v417_v26 }
  0x29   :  { %215 = vmatpush1.bf16.msra.mxu0 %v313_v4  ;;  %v59_v7 = vand.u32 127, %v58_v6  ;;  %v317_v19 = vld [vmem:[#allocation6 + $0x24] ss:$8 sps:$4 sm:$0xff]   ;;  %v319_v20 = vld [vmem:[#allocation6 + $0x20] ss:$8 sps:$4 sm:$0xff]   ;;  %v125_v49 = vshrl.u32 %v58_v6, 7 }
  0x2a   :  { %61 = vadd.xlane.f32.xlu0 %v299_v1  ;;  %216 = vmatprep.subr.bf16.mxu0 %v314_v5  ;;  %v320_v21 = vld [vmem:[#allocation6 + $0x34] ss:$8 sps:$4 sm:$0xff]   ;;  %v322_v22 = vld [vmem:[#allocation6 + $0x30] ss:$8 sps:$4 sm:$0xff]   ;;  %v323_v23 = vld [vmem:[#allocation6 + $0x44] ss:$8 sps:$4 sm:$0xff]  }
  0x2b   :  { %vm60_vm0 = vcmp.lt.s32.totalorder %v59_v7, 72  ;;  %v325_v24 = vld [vmem:[#allocation6 + $0x40] ss:$8 sps:$4 sm:$0xff]   ;;  %v326_v25 = vld [vmem:[#allocation6 + $0x54] ss:$8 sps:$4 sm:$0xff]   ;;  %v126_v50 = vsub.s32 0, %v125_v49 }
  0x2c   :  { %v328_v27 = vld [vmem:[#allocation6 + $0x50] ss:$8 sps:$4 sm:$0xff]   ;;  %v329_v28 = vld [vmem:[#allocation6 + $0x64] ss:$8 sps:$4 sm:$0xff]   ;;  %v331_v29 = vld [vmem:[#allocation6 + $0x60] ss:$8 sps:$4 sm:$0xff]  }
  0x2d   :  { %217 = vmatpush1.bf16.msra.mxu0 %v316_v18  ;;  %v332_v30 = vld [vmem:[#allocation6 + $0x74] ss:$8 sps:$4 sm:$0xff]   ;;  %v334_v31 = vld [vmem:[#allocation6 + $0x70] ss:$8 sps:$4 sm:$0xff]   ;;  %v130_v52 = vsub.s32 1, %v125_v49 }
  0x2e   :  { %63 = vadd.xlane.f32.xlu0 %v300_v2  ;;  %218 = vmatprep.subr.bf16.mxu0 %v317_v19  ;;  %v279_v40 = vld [vmem:[%s497_s1] ss:$0 sm:$0xff]  ;;  %s418_s1 = smov [#allocation8]  }
  0x2f   :  { %v280_v44 = vld [vmem:[%s498_s2] ss:$0 sm:$0xff]  ;;  %s266_s25 = sshll.u32 %s418_s1, 4  ;;  %s267_s25 = int_to_ptr.vmem [resolvable:$true] %s266_s25 }
  0x30   :  { %v122_v51 = vld [vmem:[%s500_s4] sm:$0x3]  ;;  %s383_s2 = scalar_lea.vmem %s267_s25, 512  ;;  %p388_p3 = scmp.lt.s32.totalorder %s267_s25, %s267_s25 }
  0x31   :  { %219 = vmatpush1.bf16.msra.mxu0 %v319_v20  ;;  %v127_v53 = vrot.slane %v122_v51, %v126_v50  ;;  %v131_v54 = vrot.slane %v122_v51, %v130_v52  ;;  %p384_p2 = scmp.ne.s32.totalorder %s267_s25, %s383_s2  ;;  %p389_p4 = scmp.lt.s32.totalorder %s383_s2, %s383_s2 }
  0x32   :  { %220 = vmatprep.subr.bf16.mxu0 %v320_v21 }
  0x33   :  { %p390_p5 = por %p389_p4, %p388_p3 }
  0x35   :  { %221 = vmatpush1.bf16.msra.mxu0 %v322_v22  ;;  %p391_p6 = pnand %p390_p5, %p384_p2 }
  0x36   :  { %222 = vmatprep.subr.bf16.mxu0 %v323_v23 }
  0x39   :  { %223 = vmatpush1.bf16.msra.mxu0 %v325_v24 }
  0x3a   :  { %224 = vmatprep.subr.bf16.mxu0 %v326_v25 }
  0x3d   :  { %225 = vmatpush1.bf16.msra.mxu0 %v328_v27 }
  0x3e   :  { %226 = vmatprep.subr.bf16.mxu0 %v329_v28 }
  0x41   :  { %227 = vmatpush1.bf16.msra.mxu0 %v331_v29 }
  0x42   :  { %228 = vmatprep.subr.bf16.mxu0 %v332_v30 }
  0x45   :  { %229 = vmatpush1.bf16.msra.mxu0 %v334_v31 }
  0xb7   :  { %v62_v8 = vpop.xlane.xlu0 %61 }
  0xb8   :  { %v65_v9 = vmul.f32 0.013888889, %v62_v8 }
  0xba   :  { %v67_v10 = vsub.f32 %v299_v1, %v65_v9 }
  0xbb   :  { %v64_v11 = vpop.xlane.xlu0 %63 }
  0xbc   :  { %v66_v12 = vmul.f32 0.013888889, %v64_v11  ;;  %v69_v13 = vsel %vm60_vm0, %v67_v10, 0.0 }
  0xbd   :  { %v71_v14 = vmul.f32 %v69_v13, %v69_v13 }
  0xbe   :  { %v68_v15 = vsub.f32 %v300_v2, %v66_v12 }
  0xbf   :  { %73 = vadd.xlane.f32.xlu1 %v71_v14 }
  0xc0   :  { %v70_v16 = vsel %vm60_vm0, %v68_v15, 0.0 }
  0xc1   :  { %v72_v17 = vmul.f32 %v70_v16, %v70_v16 }
  0xc3   :  { %75 = vadd.xlane.f32.xlu1 %v72_v17 }
 0x14c   :  { %v74_v32 = vpop.xlane.xlu1 %73 }
 0x14d   :  { %v77_v33 = vmul.f32 0.013888889, %v74_v32 }
 0x14f   :  { %v79_v34 = vadd.f32 1e-05, %v77_v33 }
 0x150   :  { %v76_v35 = vpop.xlane.xlu1 %75 }
 0x151   :  { %335 = vrsqrt.f32 %v79_v34  ;;  %v78_v36 = vmul.f32 0.013888889, %v76_v35 }
 0x153   :  { %v80_v37 = vadd.f32 1e-05, %v78_v36 }
 0x155   :  { %337 = vrsqrt.f32 %v80_v37 }
 0x15b   :  { %v336_v38 = vpop.eup %335 }
 0x15c   :  { %v83_v39 = vmul.f32 %v336_v38, %v69_v13 }
 0x15e   :  { %v92_v43 = vmul.f32 %v279_v40, %v83_v39 }
 0x15f   :  { %v338_v41 = vpop.eup %337 }
 0x160   :  { %v84_v42 = vmul.f32 %v338_v41, %v70_v16  ;;  %v101_v46 = vadd.f32 %v280_v44, %v92_v43 }
 0x162   :  { %v93_v45 = vmul.f32 %v279_v40, %v84_v42 }
 0x164   :  { %v102_v47 = vadd.f32 %v280_v44, %v93_v45 }
 0x166   :  { %v103_v48 = vpack.c.bf16 %v102_v47, %v101_v46 }
 0x168   :  { %247 = vmatmul.mubr.bf16.vlgmr.msra.gmra.mrb[0].mxu0 %v103_v48 }
 0x23b   :  { %v248_v55 = vpop.f32.mrb[0].mxu0 }
 0x23c   :  { %v249_v56 = vadd.f32 %v248_v55, %v127_v53  ;;  %v250_v57 = vpop.f32.mrb[1].mxu0 }
 0x23d   :  { %v251_v58 = vadd.f32 %v250_v57, %v131_v54  ;;  %v252_v59 = vpop.f32.mrb[2].mxu0 }
 0x23e   :  { %257 = vst [vmem:[#allocation8] sm:$0xff] %v249_v56  ;;  %v253_v60 = vadd.f32 %v252_v59, %v127_v53  ;;  %v254_v61 = vpop.f32.mrb[3].mxu0 }
 0x23f   :  { %258 = vst [vmem:[#allocation8 + $0x8] sm:$0xff] %v251_v58  ;;  %v255_v62 = vadd.f32 %v254_v61, %v131_v54 }
 0x240   :  { %259 = vst [vmem:[#allocation8 + $0x10] sm:$0xff] %v253_v60 }
 0x241   :  { %260 = vst [vmem:[#allocation8 + $0x18] sm:$0xff] %v255_v62 }
 0x242   :  { %394 = shalt.err (!%p391_p6)
}
 0x243   :  { %s395_s27 = scalar_lea.hbm %s501_s5, 512 }
 0x244   :  { %p396_p7 = scmp.ne.s32.totalorder %s501_s5, %s395_s27  ;;  %p399_p8 = scmp.lt.u32.totalorder %s395_s27, %s501_s5 }
 0x246   :  { %p401_p9 = pnand %p399_p8, %p396_p7 }
 0x248   :  { %404 = shalt.err (!%p401_p9)
}
 0x249   :  { %s419_s7 = smov 256   ;;  %s420_s8 = smov 16  }
 0x24a   :  { %272 = dma.vmem_to_hbm [thread:$0]  %s267_s25, 512, %s501_s5, [#allocation5], %s419_s7, %s419_s7, %s420_s8  }
 0x24b   :  { %409 = dma.done.wait [#allocation5], 512  }
 0x24c   :  { %410 = vsyncadd [#allocation5], 4294966784 }
 0x24d   :  { %276 = vsyncpa [#allocation4], 1 }
 0x24e   :  { %277 = vsyncpa [#allocation7], 1 }
 0x24f   :  { %278 = vsyncpa [#allocation5], 1 }

</bundles_post_ra>
